<compile_context>
chip_gen: v7x
topology: tpu7x:2x2x1
jax: 0.10.0
libtpu: 0.0.40
codegen_flags: <defaults>
</compile_context>

<pallas_src>
import functools

import jax
import jax.numpy as jnp
from jax.experimental import pallas as pl
from jax.experimental.pallas import tpu as pltpu


def _attention_kernel(x_ref, wqkv_ref, wout_ref, bout_ref, o_ref,
                      qkv_ref, head_out_ref, *, heads, dim_head, scale):
    """One grid step == Bb batch elements; full sequence + weights resident."""
    bb, n, dim = x_ref.shape
    inner = heads * dim_head
    cdt = x_ref.dtype                       # MXU operand dtype follows the model dtype

    # ---- fused QKV projection: one [Bb*N, dim] @ [dim, 3*inner] MXU matmul ----
    xf = x_ref[...].reshape(bb * n, dim)
    qkv = jnp.dot(xf, wqkv_ref[...], preferred_element_type=jnp.float32)
    qkv = qkv.reshape(bb, n, 3 * inner)

    # Fold the softmax scale into q once (O(N*inner) mults, not O(N^2) per head)
    # and park qkv in VMEM so the head loop uses static ref slices.
    qkv_ref[:, :, :inner] = (qkv[:, :, :inner] * scale).astype(cdt)
    qkv_ref[:, :, inner:] = qkv[:, :, inner:].astype(cdt)

    # ---- per-head attention; batch dim handled by batched einsums (no Bb unroll) ----
    for h in range(heads):                  # static unroll over a small constant
        q = qkv_ref[:, :, h * dim_head:(h + 1) * dim_head]                     # [Bb,N,dh]
        k = qkv_ref[:, :, inner + h * dim_head:inner + (h + 1) * dim_head]     # [Bb,N,dh]
        v = qkv_ref[:, :, 2 * inner + h * dim_head:2 * inner + (h + 1) * dim_head]

        dots = jnp.einsum('bid,bjd->bij', q, k,
                          preferred_element_type=jnp.float32)                  # [Bb,N,N]
        dots = dots - jnp.max(dots, axis=-1, keepdims=True)
        p = jnp.exp(dots)
        attn = p * pl.reciprocal(jnp.sum(p, axis=-1, keepdims=True), approx=True)

        out_h = jnp.einsum('bij,bjd->bid', attn.astype(cdt), v,
                           preferred_element_type=jnp.float32)                 # [Bb,N,dh]
        head_out_ref[:, :, h * dim_head:(h + 1) * dim_head] = out_h.astype(cdt)

    # ---- single output projection: [Bb*N, inner] @ [inner, dim] + bias ----
    out_flat = head_out_ref[...].reshape(bb * n, inner)
    y = jnp.dot(out_flat, wout_ref[...], preferred_element_type=jnp.float32)
    y = y + bout_ref[...]                   # bias, broadcast from [1, dim]
    o_ref[...] = y.reshape(bb, n, dim).astype(o_ref.dtype)


def _pick_batch_block(B, N):
    """Batch elements per grid step: target >=256 projection rows, keep at least
    two grid steps when possible (both v7x TensorCores), require B % Bb == 0."""
    bb = max(1, min(B, max(1, 256 // max(N, 1))))
    while B % bb:
        bb -= 1
    if bb > 1 and B // bb < 2:
        bb = max(1, bb // 2)
        while B % bb:
            bb -= 1
    return bb


def attention(x, w_qkv, w_out, b_out, *, heads, dim_head, block_b=None):
    """x: [B, N, dim]; w_qkv: [dim, 3*heads*dim_head];
    w_out: [heads*dim_head, dim]; b_out: [dim]."""
    B, N, dim = x.shape
    inner = heads * dim_head
    assert w_qkv.shape == (dim, 3 * inner)
    assert w_out.shape == (inner, dim)
    assert b_out.shape == (dim,)
    scale = float(dim_head) ** -0.5

    Bb = block_b if block_b is not None else _pick_batch_block(B, N)
    assert B % Bb == 0, (B, Bb)
    grid = (B // Bb,)

    b_out2d = b_out.reshape(1, dim)
    itemsize = jnp.dtype(x.dtype).itemsize

    # VMEM footprint: double-buffered x/out tiles + resident weights + scratches.
    tile_bytes = Bb * N * dim * itemsize
    weight_bytes = (dim * 3 * inner + inner * dim + dim) * jnp.dtype(w_qkv.dtype).itemsize
    scratch_bytes = Bb * N * 4 * inner * itemsize
    footprint = 4 * tile_bytes + 2 * weight_bytes + scratch_bytes
    vmem_limit = int(min(48 * 1024 * 1024, max(8 * 1024 * 1024, 4 * footprint)))

    flops = (2 * B * N * dim * 3 * inner              # QKV projection
             + 2 * B * heads * N * N * dim_head * 2   # QK^T and attn @ V
             + 2 * B * N * inner * dim)               # output projection
    transcendentals = B * heads * N * (N + 1)         # exp + reciprocal
    bytes_accessed = itemsize * (x.size + B * N * dim) + weight_bytes

    kernel = functools.partial(_attention_kernel, heads=heads,
                               dim_head=dim_head, scale=scale)

    return pl.pallas_call(
        kernel,
        out_shape=jax.ShapeDtypeStruct((B, N, dim), x.dtype),
        grid_spec=pltpu.PrefetchScalarGridSpec(
            num_scalar_prefetch=0,
            grid=grid,                                               # batch blocks
            in_specs=[
                pl.BlockSpec((Bb, N, dim), lambda g: (g, 0, 0)),            # x tile
                pl.BlockSpec((dim, 3 * inner), lambda g: (0, 0)),           # W_qkv (resident)
                pl.BlockSpec((inner, dim), lambda g: (0, 0)),               # W_out (resident)
                pl.BlockSpec((1, dim), lambda g: (0, 0)),                   # b_out
            ],
            out_specs=pl.BlockSpec((Bb, N, dim), lambda g: (g, 0, 0)),
            scratch_shapes=[
                pltpu.VMEM((Bb, N, 3 * inner), x.dtype),   # qkv (q pre-scaled)
                pltpu.VMEM((Bb, N, inner), x.dtype),       # concat_h(out_h)
            ],
        ),
        compiler_params=pltpu.CompilerParams(
            dimension_semantics=("parallel",),   # batch grid shards across TensorCores
            vmem_limit_bytes=vmem_limit,
        ),
        cost_estimate=pl.CostEstimate(
            flops=flops,
            transcendentals=transcendentals,
            bytes_accessed=bytes_accessed,
        ),
    )(x, w_qkv, w_out, b_out2d)


def _reference(x, w_qkv, w_out, b_out, heads, dim_head):
    B, N, dim = x.shape
    inner = heads * dim_head
    scale = float(dim_head) ** -0.5
    hp = jax.lax.Precision.HIGHEST

    qkv = jnp.einsum('bnd,de->bne', x, w_qkv, precision=hp)
    q, k, v = jnp.split(qkv, 3, axis=-1)

    def split_heads(t):
        return t.reshape(B, N, heads, dim_head).transpose(0, 2, 1, 3)

    q, k, v = map(split_heads, (q, k, v))
    dots = jnp.einsum('bhid,bhjd->bhij', q, k, precision=hp) * scale
    attn = jax.nn.softmax(dots, axis=-1)
    out = jnp.einsum('bhij,bhjd->bhid', attn, v, precision=hp)
    out = out.transpose(0, 2, 1, 3).reshape(B, N, inner)
    return jnp.einsum('bni,io->bno', out, w_out, precision=hp) + b_out


if __name__ == "__main__":
    # Small shapes consistent with the module: Attention(dim=32, heads=4,
    # dim_head=8, dropout=0.0) applied to x of shape [batch=2, tokens=8, dim=32].
    B, N, dim = 2, 8, 32
    heads, dim_head = 4, 8
    inner = heads * dim_head

    key = jax.random.PRNGKey(0)
    kx, kqkv, kow, kob = jax.random.split(key, 4)

    x = jax.random.normal(kx, (B, N, dim), dtype=jnp.float32)

    # Deterministic init mimicking nn.Linear's uniform(-1/sqrt(fan_in), 1/sqrt(fan_in)).
    lim_qkv = 1.0 / (dim ** 0.5)
    lim_out = 1.0 / (inner ** 0.5)
    w_qkv = jax.random.uniform(kqkv, (dim, 3 * inner), jnp.float32, -lim_qkv, lim_qkv)
    w_out = jax.random.uniform(kow, (inner, dim), jnp.float32, -lim_out, lim_out)
    b_out = jax.random.uniform(kob, (dim,), jnp.float32, -lim_out, lim_out)

    out = attention(x, w_qkv, w_out, b_out, heads=heads, dim_head=dim_head)
    out = jax.block_until_ready(out)

    ref = _reference(x, w_qkv, w_out, b_out, heads, dim_head)
    assert out.shape == (B, N, dim)
    assert jnp.allclose(out, ref, atol=1e-3, rtol=1e-3), float(jnp.max(jnp.abs(out - ref)))

    print("KERNEL_OK")
</pallas_src>

<mosaic_0001>
module attributes {stable_mosaic.version = 11 : i64} {
  func.func @_attention_kernel(%arg0: i32, %arg1: memref<1x8x32xf32, #tpu.memory_space<vmem>>, %arg2: memref<32x96xf32, #tpu.memory_space<vmem>>, %arg3: memref<32x32xf32, #tpu.memory_space<vmem>>, %arg4: memref<1x32xf32, #tpu.memory_space<vmem>>, %arg5: memref<1x8x32xf32, #tpu.memory_space<vmem>>, %arg6: memref<1x8x96xf32, #tpu.memory_space<vmem>>, %arg7: memref<1x8x32xf32, #tpu.memory_space<vmem>>) attributes {dimension_semantics = [#tpu.dimension_semantics<parallel>], iteration_bounds = array<i64: 2>, scalar_prefetch = 0 : i64, scratch_operands = 2 : i64, tpu.core_type = #tpu.core_type<tc>, window_params = [{transform_indices = @transform_0, window_bounds = array<i64: 1, 8, 32>}, {pipeline_mode = #tpu.pipeline_mode<synchronous>, transform_indices = @transform_1, window_bounds = array<i64: 32, 96>}, {pipeline_mode = #tpu.pipeline_mode<synchronous>, transform_indices = @transform_2, window_bounds = array<i64: 32, 32>}, {pipeline_mode = #tpu.pipeline_mode<synchronous>, transform_indices = @transform_3, window_bounds = array<i64: 1, 32>}, {transform_indices = @transform_4, window_bounds = array<i64: 1, 8, 32>}]} {
    %c0 = arith.constant 0 : index
    %c0_0 = arith.constant 0 : index
    %c0_1 = arith.constant 0 : index
    %0 = vector.load %arg1[%c0, %c0_0, %c0_1] : memref<1x8x32xf32, #tpu.memory_space<vmem>>, vector<1x8x32xf32>
    %1 = vector.shape_cast %0 : vector<1x8x32xf32> to vector<8x32xf32>
    %c0_2 = arith.constant 0 : index
    %c0_3 = arith.constant 0 : index
    %2 = vector.load %arg2[%c0_2, %c0_3] : memref<32x96xf32, #tpu.memory_space<vmem>>, vector<32x96xf32>
    %cst = arith.constant dense<0.000000e+00> : vector<8x96xf32>
    %3 = tpu.matmul %1, %2, %cst {dimension_numbers = #tpu.dot_dimension_numbers<[1], [0], [0], [1], [0, 0, 1, 1], [], []>} : vector<8x32xf32>, vector<32x96xf32>, vector<8x96xf32> -> vector<8x96xf32>
    %4 = vector.shape_cast %3 : vector<8x96xf32> to vector<1x8x96xf32>
    %5 = vector.extract_strided_slice %4 {offsets = [0, 0, 0], sizes = [1, 8, 32], strides = [1, 1, 1]} : vector<1x8x96xf32> to vector<1x8x32xf32>
    %cst_4 = arith.constant 0.353553385 : f32
    %6 = vector.broadcast %cst_4 : f32 to vector<1x8x32xf32>
    %7 = arith.mulf %5, %6 : vector<1x8x32xf32>
    %c0_5 = arith.constant 0 : index
    %c0_6 = arith.constant 0 : index
    %c0_7 = arith.constant 0 : index
    %8 = vector.load %arg6[%c0_5, %c0_6, %c0_7] : memref<1x8x96xf32, #tpu.memory_space<vmem>>, vector<1x8x32xf32>
    tpu.vector_store %arg6[%c0_5, %c0_6, %c0_7], %7 {strides = array<i32>} : memref<1x8x96xf32, #tpu.memory_space<vmem>>, vector<1x8x32xf32>,
    %9 = vector.extract_strided_slice %4 {offsets = [0, 0, 32], sizes = [1, 8, 64], strides = [1, 1, 1]} : vector<1x8x96xf32> to vector<1x8x64xf32>
    %c0_8 = arith.constant 0 : index
    %c0_9 = arith.constant 0 : index
    %c32 = arith.constant 32 : index
    %10 = vector.load %arg6[%c0_8, %c0_9, %c32] : memref<1x8x96xf32, #tpu.memory_space<vmem>>, vector<1x8x64xf32>
    tpu.vector_store %arg6[%c0_8, %c0_9, %c32], %9 {strides = array<i32>} : memref<1x8x96xf32, #tpu.memory_space<vmem>>, vector<1x8x64xf32>,
    %c0_10 = arith.constant 0 : index
    %c0_11 = arith.constant 0 : index
    %c0_12 = arith.constant 0 : index
    %11 = vector.load %arg6[%c0_10, %c0_11, %c0_12] : memref<1x8x96xf32, #tpu.memory_space<vmem>>, vector<1x8x8xf32>
    %c0_13 = arith.constant 0 : index
    %c0_14 = arith.constant 0 : index
    %c32_15 = arith.constant 32 : index
    %12 = vector.load %arg6[%c0_13, %c0_14, %c32_15] : memref<1x8x96xf32, #tpu.memory_space<vmem>>, vector<1x8x8xf32>
    %c0_16 = arith.constant 0 : index
    %c0_17 = arith.constant 0 : index
    %c64 = arith.constant 64 : index
    %13 = vector.load %arg6[%c0_16, %c0_17, %c64] : memref<1x8x96xf32, #tpu.memory_space<vmem>>, vector<1x8x8xf32>
    "tpu.trace_start"() <{level = 10 : i32, message = "bid,bjd->bij"}> : () -> ()
    %cst_18 = arith.constant dense<0.000000e+00> : vector<1x8x8xf32>
    %14 = tpu.matmul %11, %12, %cst_18 {dimension_numbers = #tpu.dot_dimension_numbers<[2], [2], [1], [1], [0, 0, 0, 1, 1, 1], [0], [0]>} : vector<1x8x8xf32>, vector<1x8x8xf32>, vector<1x8x8xf32> -> vector<1x8x8xf32>
    "tpu.trace_stop"() : () -> ()
    %cst_19 = arith.constant dense<0xFF800000> : vector<1x8xf32>
    %15 = vector.multi_reduction <maximumf>, %14, %cst_19 [2] : vector<1x8x8xf32> to vector<1x8xf32>
    %16 = vector.shape_cast %15 : vector<1x8xf32> to vector<1x8x1xf32>
    %17 = vector.broadcast %16 : vector<1x8x1xf32> to vector<1x8x8xf32>
    %18 = arith.subf %14, %17 : vector<1x8x8xf32>
    %19 = math.exp %18 : vector<1x8x8xf32>
    %cst_20 = arith.constant dense<0.000000e+00> : vector<1x8xf32>
    %20 = vector.multi_reduction <add>, %19, %cst_20 [2] : vector<1x8x8xf32> to vector<1x8xf32>
    %21 = vector.shape_cast %20 : vector<1x8xf32> to vector<1x8x1xf32>
    %22 = tpu.reciprocal %21 {approx = true} : vector<1x8x1xf32> -> vector<1x8x1xf32>
    %23 = vector.broadcast %22 : vector<1x8x1xf32> to vector<1x8x8xf32>
    %24 = arith.mulf %19, %23 : vector<1x8x8xf32>
    "tpu.trace_start"() <{level = 10 : i32, message = "bij,bjd->bid"}> : () -> ()
    %cst_21 = arith.constant dense<0.000000e+00> : vector<1x8x8xf32>
    %25 = tpu.matmul %24, %13, %cst_21 {dimension_numbers = #tpu.dot_dimension_numbers<[2], [1], [1], [2], [0, 0, 0, 1, 1, 2], [0], [0]>} : vector<1x8x8xf32>, vector<1x8x8xf32>, vector<1x8x8xf32> -> vector<1x8x8xf32>
    "tpu.trace_stop"() : () -> ()
    %c0_22 = arith.constant 0 : index
    %c0_23 = arith.constant 0 : index
    %c0_24 = arith.constant 0 : index
    %26 = vector.load %arg7[%c0_22, %c0_23, %c0_24] : memref<1x8x32xf32, #tpu.memory_space<vmem>>, vector<1x8x8xf32>
    tpu.vector_store %arg7[%c0_22, %c0_23, %c0_24], %25 {strides = array<i32>} : memref<1x8x32xf32, #tpu.memory_space<vmem>>, vector<1x8x8xf32>,
    %c0_25 = arith.constant 0 : index
    %c0_26 = arith.constant 0 : index
    %c8 = arith.constant 8 : index
    %27 = vector.load %arg6[%c0_25, %c0_26, %c8] : memref<1x8x96xf32, #tpu.memory_space<vmem>>, vector<1x8x8xf32>
    %c0_27 = arith.constant 0 : index
    %c0_28 = arith.constant 0 : index
    %c40 = arith.constant 40 : index
    %28 = vector.load %arg6[%c0_27, %c0_28, %c40] : memref<1x8x96xf32, #tpu.memory_space<vmem>>, vector<1x8x8xf32>
    %c0_29 = arith.constant 0 : index
    %c0_30 = arith.constant 0 : index
    %c72 = arith.constant 72 : index
    %29 = vector.load %arg6[%c0_29, %c0_30, %c72] : memref<1x8x96xf32, #tpu.memory_space<vmem>>, vector<1x8x8xf32>
    "tpu.trace_start"() <{level = 10 : i32, message = "bid,bjd->bij"}> : () -> ()
    %cst_31 = arith.constant dense<0.000000e+00> : vector<1x8x8xf32>
    %30 = tpu.matmul %27, %28, %cst_31 {dimension_numbers = #tpu.dot_dimension_numbers<[2], [2], [1], [1], [0, 0, 0, 1, 1, 1], [0], [0]>} : vector<1x8x8xf32>, vector<1x8x8xf32>, vector<1x8x8xf32> -> vector<1x8x8xf32>
    "tpu.trace_stop"() : () -> ()
    %cst_32 = arith.constant dense<0xFF800000> : vector<1x8xf32>
    %31 = vector.multi_reduction <maximumf>, %30, %cst_32 [2] : vector<1x8x8xf32> to vector<1x8xf32>
    %32 = vector.shape_cast %31 : vector<1x8xf32> to vector<1x8x1xf32>
    %33 = vector.broadcast %32 : vector<1x8x1xf32> to vector<1x8x8xf32>
    %34 = arith.subf %30, %33 : vector<1x8x8xf32>
    %35 = math.exp %34 : vector<1x8x8xf32>
    %cst_33 = arith.constant dense<0.000000e+00> : vector<1x8xf32>
    %36 = vector.multi_reduction <add>, %35, %cst_33 [2] : vector<1x8x8xf32> to vector<1x8xf32>
    %37 = vector.shape_cast %36 : vector<1x8xf32> to vector<1x8x1xf32>
    %38 = tpu.reciprocal %37 {approx = true} : vector<1x8x1xf32> -> vector<1x8x1xf32>
    %39 = vector.broadcast %38 : vector<1x8x1xf32> to vector<1x8x8xf32>
    %40 = arith.mulf %35, %39 : vector<1x8x8xf32>
    "tpu.trace_start"() <{level = 10 : i32, message = "bij,bjd->bid"}> : () -> ()
    %cst_34 = arith.constant dense<0.000000e+00> : vector<1x8x8xf32>
    %41 = tpu.matmul %40, %29, %cst_34 {dimension_numbers = #tpu.dot_dimension_numbers<[2], [1], [1], [2], [0, 0, 0, 1, 1, 2], [0], [0]>} : vector<1x8x8xf32>, vector<1x8x8xf32>, vector<1x8x8xf32> -> vector<1x8x8xf32>
    "tpu.trace_stop"() : () -> ()
    %c0_35 = arith.constant 0 : index
    %c0_36 = arith.constant 0 : index
    %c8_37 = arith.constant 8 : index
    %42 = vector.load %arg7[%c0_35, %c0_36, %c8_37] : memref<1x8x32xf32, #tpu.memory_space<vmem>>, vector<1x8x8xf32>
    tpu.vector_store %arg7[%c0_35, %c0_36, %c8_37], %41 {strides = array<i32>} : memref<1x8x32xf32, #tpu.memory_space<vmem>>, vector<1x8x8xf32>,
    %c0_38 = arith.constant 0 : index
    %c0_39 = arith.constant 0 : index
    %c16 = arith.constant 16 : index
    %43 = vector.load %arg6[%c0_38, %c0_39, %c16] : memref<1x8x96xf32, #tpu.memory_space<vmem>>, vector<1x8x8xf32>
    %c0_40 = arith.constant 0 : index
    %c0_41 = arith.constant 0 : index
    %c48 = arith.constant 48 : index
    %44 = vector.load %arg6[%c0_40, %c0_41, %c48] : memref<1x8x96xf32, #tpu.memory_space<vmem>>, vector<1x8x8xf32>
    %c0_42 = arith.constant 0 : index
    %c0_43 = arith.constant 0 : index
    %c80 = arith.constant 80 : index
    %45 = vector.load %arg6[%c0_42, %c0_43, %c80] : memref<1x8x96xf32, #tpu.memory_space<vmem>>, vector<1x8x8xf32>
    "tpu.trace_start"() <{level = 10 : i32, message = "bid,bjd->bij"}> : () -> ()
    %cst_44 = arith.constant dense<0.000000e+00> : vector<1x8x8xf32>
    %46 = tpu.matmul %43, %44, %cst_44 {dimension_numbers = #tpu.dot_dimension_numbers<[2], [2], [1], [1], [0, 0, 0, 1, 1, 1], [0], [0]>} : vector<1x8x8xf32>, vector<1x8x8xf32>, vector<1x8x8xf32> -> vector<1x8x8xf32>
    "tpu.trace_stop"() : () -> ()
    %cst_45 = arith.constant dense<0xFF800000> : vector<1x8xf32>
    %47 = vector.multi_reduction <maximumf>, %46, %cst_45 [2] : vector<1x8x8xf32> to vector<1x8xf32>
    %48 = vector.shape_cast %47 : vector<1x8xf32> to vector<1x8x1xf32>
    %49 = vector.broadcast %48 : vector<1x8x1xf32> to vector<1x8x8xf32>
    %50 = arith.subf %46, %49 : vector<1x8x8xf32>
    %51 = math.exp %50 : vector<1x8x8xf32>
    %cst_46 = arith.constant dense<0.000000e+00> : vector<1x8xf32>
    %52 = vector.multi_reduction <add>, %51, %cst_46 [2] : vector<1x8x8xf32> to vector<1x8xf32>
    %53 = vector.shape_cast %52 : vector<1x8xf32> to vector<1x8x1xf32>
    %54 = tpu.reciprocal %53 {approx = true} : vector<1x8x1xf32> -> vector<1x8x1xf32>
    %55 = vector.broadcast %54 : vector<1x8x1xf32> to vector<1x8x8xf32>
    %56 = arith.mulf %51, %55 : vector<1x8x8xf32>
    "tpu.trace_start"() <{level = 10 : i32, message = "bij,bjd->bid"}> : () -> ()
    %cst_47 = arith.constant dense<0.000000e+00> : vector<1x8x8xf32>
    %57 = tpu.matmul %56, %45, %cst_47 {dimension_numbers = #tpu.dot_dimension_numbers<[2], [1], [1], [2], [0, 0, 0, 1, 1, 2], [0], [0]>} : vector<1x8x8xf32>, vector<1x8x8xf32>, vector<1x8x8xf32> -> vector<1x8x8xf32>
    "tpu.trace_stop"() : () -> ()
    %c0_48 = arith.constant 0 : index
    %c0_49 = arith.constant 0 : index
    %c16_50 = arith.constant 16 : index
    %58 = vector.load %arg7[%c0_48, %c0_49, %c16_50] : memref<1x8x32xf32, #tpu.memory_space<vmem>>, vector<1x8x8xf32>
    tpu.vector_store %arg7[%c0_48, %c0_49, %c16_50], %57 {strides = array<i32>} : memref<1x8x32xf32, #tpu.memory_space<vmem>>, vector<1x8x8xf32>,
    %c0_51 = arith.constant 0 : index
    %c0_52 = arith.constant 0 : index
    %c24 = arith.constant 24 : index
    %59 = vector.load %arg6[%c0_51, %c0_52, %c24] : memref<1x8x96xf32, #tpu.memory_space<vmem>>, vector<1x8x8xf32>
    %c0_53 = arith.constant 0 : index
    %c0_54 = arith.constant 0 : index
    %c56 = arith.constant 56 : index
    %60 = vector.load %arg6[%c0_53, %c0_54, %c56] : memref<1x8x96xf32, #tpu.memory_space<vmem>>, vector<1x8x8xf32>
    %c0_55 = arith.constant 0 : index
    %c0_56 = arith.constant 0 : index
    %c88 = arith.constant 88 : index
    %61 = vector.load %arg6[%c0_55, %c0_56, %c88] : memref<1x8x96xf32, #tpu.memory_space<vmem>>, vector<1x8x8xf32>
    "tpu.trace_start"() <{level = 10 : i32, message = "bid,bjd->bij"}> : () -> ()
    %cst_57 = arith.constant dense<0.000000e+00> : vector<1x8x8xf32>
    %62 = tpu.matmul %59, %60, %cst_57 {dimension_numbers = #tpu.dot_dimension_numbers<[2], [2], [1], [1], [0, 0, 0, 1, 1, 1], [0], [0]>} : vector<1x8x8xf32>, vector<1x8x8xf32>, vector<1x8x8xf32> -> vector<1x8x8xf32>
    "tpu.trace_stop"() : () -> ()
    %cst_58 = arith.constant dense<0xFF800000> : vector<1x8xf32>
    %63 = vector.multi_reduction <maximumf>, %62, %cst_58 [2] : vector<1x8x8xf32> to vector<1x8xf32>
    %64 = vector.shape_cast %63 : vector<1x8xf32> to vector<1x8x1xf32>
    %65 = vector.broadcast %64 : vector<1x8x1xf32> to vector<1x8x8xf32>
    %66 = arith.subf %62, %65 : vector<1x8x8xf32>
    %67 = math.exp %66 : vector<1x8x8xf32>
    %cst_59 = arith.constant dense<0.000000e+00> : vector<1x8xf32>
    %68 = vector.multi_reduction <add>, %67, %cst_59 [2] : vector<1x8x8xf32> to vector<1x8xf32>
    %69 = vector.shape_cast %68 : vector<1x8xf32> to vector<1x8x1xf32>
    %70 = tpu.reciprocal %69 {approx = true} : vector<1x8x1xf32> -> vector<1x8x1xf32>
    %71 = vector.broadcast %70 : vector<1x8x1xf32> to vector<1x8x8xf32>
    %72 = arith.mulf %67, %71 : vector<1x8x8xf32>
    "tpu.trace_start"() <{level = 10 : i32, message = "bij,bjd->bid"}> : () -> ()
    %cst_60 = arith.constant dense<0.000000e+00> : vector<1x8x8xf32>
    %73 = tpu.matmul %72, %61, %cst_60 {dimension_numbers = #tpu.dot_dimension_numbers<[2], [1], [1], [2], [0, 0, 0, 1, 1, 2], [0], [0]>} : vector<1x8x8xf32>, vector<1x8x8xf32>, vector<1x8x8xf32> -> vector<1x8x8xf32>
    "tpu.trace_stop"() : () -> ()
    %c0_61 = arith.constant 0 : index
    %c0_62 = arith.constant 0 : index
    %c24_63 = arith.constant 24 : index
    %74 = vector.load %arg7[%c0_61, %c0_62, %c24_63] : memref<1x8x32xf32, #tpu.memory_space<vmem>>, vector<1x8x8xf32>
    tpu.vector_store %arg7[%c0_61, %c0_62, %c24_63], %73 {strides = array<i32>} : memref<1x8x32xf32, #tpu.memory_space<vmem>>, vector<1x8x8xf32>,
    %c0_64 = arith.constant 0 : index
    %c0_65 = arith.constant 0 : index
    %c0_66 = arith.constant 0 : index
    %75 = vector.load %arg7[%c0_64, %c0_65, %c0_66] : memref<1x8x32xf32, #tpu.memory_space<vmem>>, vector<1x8x32xf32>
    %76 = vector.shape_cast %75 : vector<1x8x32xf32> to vector<8x32xf32>
    %c0_67 = arith.constant 0 : index
    %c0_68 = arith.constant 0 : index
    %77 = vector.load %arg3[%c0_67, %c0_68] : memref<32x32xf32, #tpu.memory_space<vmem>>, vector<32x32xf32>
    %cst_69 = arith.constant dense<0.000000e+00> : vector<8x32xf32>
    %78 = tpu.matmul %76, %77, %cst_69 {dimension_numbers = #tpu.dot_dimension_numbers<[1], [0], [0], [1], [0, 0, 1, 1], [], []>} : vector<8x32xf32>, vector<32x32xf32>, vector<8x32xf32> -> vector<8x32xf32>
    %c0_70 = arith.constant 0 : index
    %c0_71 = arith.constant 0 : index
    %79 = vector.load %arg4[%c0_70, %c0_71] : memref<1x32xf32, #tpu.memory_space<vmem>>, vector<1x32xf32>
    %80 = vector.broadcast %79 : vector<1x32xf32> to vector<8x32xf32>
    %81 = arith.addf %78, %80 : vector<8x32xf32>
    %82 = vector.shape_cast %81 : vector<8x32xf32> to vector<1x8x32xf32>
    %c0_72 = arith.constant 0 : index
    %c0_73 = arith.constant 0 : index
    %c0_74 = arith.constant 0 : index
    %83 = vector.load %arg5[%c0_72, %c0_73, %c0_74] : memref<1x8x32xf32, #tpu.memory_space<vmem>>, vector<1x8x32xf32>
    tpu.vector_store %arg5[%c0_72, %c0_73, %c0_74], %82 {strides = array<i32>} : memref<1x8x32xf32, #tpu.memory_space<vmem>>, vector<1x8x32xf32>,
    return
  }
  func.func @transform_0(%arg0: i32) -> (i32, i32, i32) {
    %c0_i32 = arith.constant 0 : i32
    %c0_i32_0 = arith.constant 0 : i32
    %c0_i32_1 = arith.constant 0 : i32
    return %arg0, %c0_i32, %c0_i32_0 : i32, i32, i32
  }
  func.func @transform_1(%arg0: i32) -> (i32, i32) {
    %c0_i32 = arith.constant 0 : i32
    %c0_i32_0 = arith.constant 0 : i32
    %c0_i32_1 = arith.constant 0 : i32
    return %c0_i32, %c0_i32_0 : i32, i32
  }
  func.func @transform_2(%arg0: i32) -> (i32, i32) {
    %c0_i32 = arith.constant 0 : i32
    %c0_i32_0 = arith.constant 0 : i32
    %c0_i32_1 = arith.constant 0 : i32
    return %c0_i32, %c0_i32_0 : i32, i32
  }
  func.func @transform_3(%arg0: i32) -> (i32, i32) {
    %c0_i32 = arith.constant 0 : i32
    %c0_i32_0 = arith.constant 0 : i32
    %c0_i32_1 = arith.constant 0 : i32
    return %c0_i32, %c0_i32_0 : i32, i32
  }
  func.func @transform_4(%arg0: i32) -> (i32, i32, i32) {
    %c0_i32 = arith.constant 0 : i32
    %c0_i32_0 = arith.constant 0 : i32
    %c0_i32_1 = arith.constant 0 : i32
    return %arg0, %c0_i32, %c0_i32_0 : i32, i32, i32
  }
}

</mosaic_0001>

<bundles_post_ra>
// kernel: tpu_custom_call.1
= control target key start
LH: loop header
LB: loop body
LE: loop exit
PB: predicated region body
PF: predicated region fallthrough
CT: control target
= control target key end

     0   :  { %9 = vsyncpa [#allocation5], 0  ;;  %s1946_s0 = inlined_call_operand.hbm [shape: f32[2,8,32], index: 0, kind: input, shape index: {}]   ;;  %s1947_s1 = inlined_call_operand.hbm [shape: f32[32,96], index: 1, kind: input, shape index: {}]   ;;  %s1948_s2 = inlined_call_operand.hbm [shape: f32[32,32], index: 2, kind: input, shape index: {}]   ;;  %s1949_s3 = inlined_call_operand.vmem [shape: f32[1,32], index: 3, kind: input, shape index: {}]   ;;  %s1950_s4 = inlined_call_operand.hbm [shape: f32[2,8,32], index: 4, kind: output, shape index: {}]  }
   0x1   :  { %11 = vsyncpa [#allocation5 + $0x1], 0 }
   0x2   :  { %12 = vsyncpa [#allocation8], 0 }
   0x3   :  { %13 = vsyncpa [#allocation6], 0 }
   0x4   :  { %15 = vsyncpa [#allocation6 + $0x1], 0  ;;  %s1639_s15 = smov 0   ;;  %s1641_s16 = smov 0  }
   0x5   :  { %s1643_s17 = smov 0   ;;  %s1645_s18 = smov 0  }
   0x6 LB: > { %s1660_s19 = sadd.s32 4294967295, %s1589_s18   ;;  %s1200_s20 = sadd.s32 4294967294, %s1589_s18   ;;  %s1589_s18 = sphi %s1645_s18, %s1970_s18   ;;  %s1585_s17 = sphi %s1643_s17, %s1969_s17   ;;  %s1581_s16 = sphi %s1641_s16, %s1968_s16   ;;  %s1577_s15 = sphi %s1639_s15, %s1967_s15  }
   0x7   : > { %p41_p0 = scmp.ne.s32.totalorder %s1581_s16, %s1577_s15  ;;  %p1951_p1 = scmp.eq.s32.totalorder %s1660_s19, 0 }
   0x8   : > { %p134_p3 = scmp.eq.s32.totalorder %s1200_s20, 1  ;;  %p1201_p5 = scmp.ge.s32.totalorder %s1589_s18, 1 }
   0x9   : > { %p1669_p4 = por %p1951_p1, %p41_p0  ;;  %p141_p7 = scmp.lt.s32.totalorder %s1589_s18, 3 }
   0xa   : > { %p1674_p6 = por %p134_p3, %p41_p0  ;;  %s1591_s24 = smov [#allocation7]  }
   0xb   : > { %s1954_s21 = scalar_select %p1669_p4, 1, 0 }
   0xc   : > { %s1955_s22 = scalar_select %p1674_p6, 1, 0 }
   0xd   : > { %p1679_p8 = pnand %p1201_p5, %p141_p7  ;;  %s153_s25 = sshll.u32 %s1591_s24, 4  ;;  %s1683_s25 = int_to_ptr.vmem [resolvable:$true] %s153_s25 }
   0xe   : > { %s1592_s27 = smov [#allocation9]   ;;  %s1433_s5 = scalar_lea.hbm %s1947_s1, 512 }
   0xf   : > { %p1343_p9 = pneg %p1679_p8  ;;  %s166_s28 = sshll.u32 %s1592_s27, 4  ;;  %s1694_s28 = int_to_ptr.vmem [resolvable:$true] %s166_s28 }
  0x10   : > { %p1434_p12 = scmp.ne.s32.totalorder %s1947_s1, %s1433_s5  ;;  %p1440_p5 = scmp.lt.u32.totalorder %s1433_s5, %s1947_s1 }
  0x11   : > { %p1690_p11 = pnand %p1343_p9, %p1951_p1 }
  0x13   : > { %p1435_p13 = pneg %p1690_p11 }
  0x15   : > { %p1436_p0 = pnand %p1435_p13, %p1434_p12 }
  0x17   : > { %p1437_p3 = pneg %p1436_p0 }
  0x19   : > { %p1442_p7 = pnand %p1440_p5, %p1437_p3 }
  0x1b   : > { %1445 = shalt.err (!%p1442_p7)
}
  0x1c   : > { %s1446_s10 = scalar_lea.vmem %s1683_s25, 512  ;;  %p1454_p2 = scmp.lt.s32.totalorder %s1683_s25, %s1683_s25 }
  0x1d   : > { %p1447_p9 = scmp.ne.s32.totalorder %s1683_s25, %s1446_s10  ;;  %p1455_p12 = scmp.lt.s32.totalorder %s1446_s10, %s1446_s10 }
  0x1f   : > { %p1449_p10 = pnand %p1447_p9, %p1435_p13  ;;  %p1456_p0 = por %p1455_p12, %p1454_p2 }
  0x21   : > { %p1450_p1 = pneg %p1449_p10 }
  0x23   : > { %p1457_p6 = pnand %p1456_p0, %p1450_p1 }
  0x25   : > { %1460 = shalt.err (!%p1457_p6)
}
  0x26   : > { %s1593_s11 = smov 128   ;;  %s1594_s12 = smov 8  }
  0x27   : > { %1346 = dma.hbm_to_vmem [thread:$0]  (!%p1690_p11), %s1947_s1, 512, %s1683_s25, [#allocation8], %s1593_s11, %s1593_s11, %s1594_s12  }
  0x28   : > { %s1461_s27 = scalar_lea.hbm %s1948_s2, 512 }
  0x29   : > { %p1462_p2 = scmp.ne.s32.totalorder %s1948_s2, %s1461_s27  ;;  %p1468_p10 = scmp.lt.u32.totalorder %s1461_s27, %s1948_s2 }
  0x2b   : > { %p1464_p1 = pnand %p1462_p2, %p1435_p13 }
  0x2d   : > { %p1465_p6 = pneg %p1464_p1 }
  0x2f   : > { %p1470_p3 = pnand %p1468_p10, %p1465_p6 }
  0x31   : > { %1473 = shalt.err (!%p1470_p3)
}
  0x32   : > { %s1474_s25 = scalar_lea.vmem %s1694_s28, 512  ;;  %p1482_p12 = scmp.lt.s32.totalorder %s1694_s28, %s1694_s28 }
  0x33   : > { %p1475_p5 = scmp.ne.s32.totalorder %s1694_s28, %s1474_s25  ;;  %p1483_p0 = scmp.lt.s32.totalorder %s1474_s25, %s1474_s25 }
  0x35   : > { %p1477_p7 = pnand %p1475_p5, %p1435_p13  ;;  %p1484_p2 = por %p1483_p0, %p1482_p12 }
  0x37   : > { %p1478_p9 = pneg %p1477_p7 }
  0x39   : > { %p1485_p1 = pnand %p1484_p2, %p1478_p9 }
  0x3b   : > { %1488 = shalt.err (!%p1485_p1)
}
  0x3c   : > { %1349 = dma.hbm_to_vmem [thread:$0]  (!%p1690_p11), %s1948_s2, 512, %s1694_s28, [#allocation8], %s1593_s11, %s1593_s11, %s1594_s12  }
  0x3d   : > { %s1749_s9 = sadd.s32 1, %s1589_s18   ;;  %s28_s26 = sadd.s32 1, %s1585_s17 }
  0x3e   : > { %s25_s10 = ssub.s32 %s1589_s18, %s1749_s9  ;;  %p35_p13 = scmp.ne.s32.totalorder %s1585_s17, %s1581_s16 }
  0x3f   : > { %p26_p6 = scmp.eq.s32.totalorder %s25_s10, 0  ;;  %p36_p10 = scmp.eq.s32.totalorder %s1589_s18, 0 }
  0x40   : > { %p1958_p3 = scmp.eq.s32.totalorder %s1660_s19, 1  ;;  %p1360_p7 = scmp.lt.s32.totalorder %s1589_s18, 2 }
  0x41   : > { %s1765_s14 = scalar_select %p26_p6, %s1585_s17, %s28_s26  }
  0x42   : > { %p1759_p5 = por %p1958_p3, %p35_p13  ;;  %p37_p9 = por %p36_p10, %p35_p13 }
  0x43   : > { %s183_s20 = sand.u32 1, %s1585_s17   ;;  %s1206_s28 = sshll.u32 %s1589_s18, 7 }
  0x44   : > { %s1959_s13 = scalar_select %p1759_p5, 1, 0 }
  0x45   : > { %s1205_s24 = sshll.u32 %s183_s20, 3  ;;  %s1772_s27 = scalar_lea.hbm %s1946_s0, %s1206_s28 }
  0x46   : > { %s187_s29 = scalar_lea.vmem [#allocation4], %s1205_s24  ;;  %p1776_p11 = pnand %p1360_p7, %p37_p9 }
  0x47   : > { %s194_s30 = sshll.u32 %s187_s29, 4  ;;  %s184_s6 = scalar_lea.sflag [#allocation5], %s183_s20  ;;  %s1774_s30 = int_to_ptr.vmem [resolvable:$true] %s194_s30 }
  0x48   : > { %s1489_s25 = scalar_lea.hbm %s1772_s27, 128  ;;  %p1491_p0 = pneg %p1776_p11 }
  0x49   : > { %p1490_p12 = scmp.ne.s32.totalorder %s1772_s27, %s1489_s25  ;;  %s1494_s26 = scalar_lea.hbm %s1946_s0, 256 }
  0x4a   : > { %p1495_p13 = scmp.lt.u32.totalorder %s1772_s27, %s1946_s0  ;;  %p1496_p6 = scmp.lt.u32.totalorder %s1494_s26, %s1489_s25 }
  0x4b   : > { %p1492_p2 = pnand %p1491_p0, %p1490_p12  ;;  %p1498_p3 = scmp.lt.u32.totalorder %s1489_s25, %s1772_s27 }
  0x4c   : > { %p1497_p10 = por %p1496_p6, %p1495_p13 }
  0x4d   : > { %p1493_p1 = pneg %p1492_p2 }
  0x4e   : > { %p1499_p7 = por %p1498_p3, %p1497_p10 }
  0x50   : > { %p1500_p9 = pnand %p1499_p7, %p1493_p1 }
  0x52   : > { %1503 = shalt.err (!%p1500_p9)
}
  0x53   : > { %s1504_s20 = scalar_lea.vmem %s1774_s30, 128  ;;  %s1595_s28 = smov [#allocation4]  }
  0x54   : > { %p1505_p12 = scmp.ne.s32.totalorder %s1774_s30, %s1504_s20  ;;  %s1509_s11 = sshll.u32 %s1595_s28, 4  ;;  %s1510_s11 = int_to_ptr.vmem [resolvable:$false] %s1509_s11 }
  0x55   : > { %s1511_s12 = scalar_lea.vmem %s1510_s11, 256  ;;  %p1512_p4 = scmp.lt.s32.totalorder %s1774_s30, %s1510_s11 }
  0x56   : > { %p1507_p2 = pnand %p1505_p12, %p1491_p0  ;;  %p1513_p13 = scmp.lt.s32.totalorder %s1511_s12, %s1504_s20 }
  0x58   : > { %p1508_p5 = pneg %p1507_p2  ;;  %p1514_p6 = por %p1513_p13, %p1512_p4 }
  0x5a   : > { %p1515_p10 = pnand %p1514_p6, %p1508_p5 }
  0x5c   : > { %1518 = shalt.err (!%p1515_p10)
}
  0x5d   : > { %1353 = dma.hbm_to_vmem [thread:$0]  (!%p1776_p11), %s1772_s27, 128, %s1774_s30, %s184_s6  }
  0x5e   : > { %203 = sbr.rel (%p1679_p8) target bundleno = 2123 (0x84b), region = 36  ;;  %s1808_s29 = sand.u32 (!%p1679_p8), 1, %s1581_s16  }
  0x5f   : > { %s1208_s25 = sshll.u32 (!%p1679_p8), %s1808_s29, 3  ;;  %s206_s7 = scalar_lea.sflag (!%p1679_p8), [#allocation5], %s1808_s29 }
  0x60   : > { %s209_s8 = scalar_lea.vmem (!%p1679_p8), [#allocation4], %s1208_s25  ;;  %p1961_p4 = scmp.ne.s32.totalorder (!%p1679_p8), %s1954_s21, 0 }
  0x65   : > { %1564 = dma.done.wait (%p1961_p4), %s206_s7, 128  }
  0x66   : > { %1566 = vsyncadd (%p1961_p4), %s206_s7, 4294967168  ;;  %p1962_p5 = scmp.eq.s32.totalorder %s1660_s19, 0 }
  0x68   : > { %1568 = dma.done.wait (%p1962_p5), [#allocation8], 1024   ;;  %p1963_p8 = pmov %p1962_p5 }
  0x69   : > { %v1596_v0 = vmov 0.0|0.0   ;;  %vm1597_vm0 = vmmov 0   ;;  %v1598_v1 = vmov 0.0   ;;  %v243_v2 = vld [vmem:[#allocation7] sm:$0xff]  ;;  %v244_v3 = vld [vmem:[#allocation7 + $0x8] sm:$0xff]  ;;  %v245_v4 = vld [vmem:[#allocation7 + $0x10] sm:$0xff] }
  0x6a   : > { %1570 = vsyncadd (%p1963_p8), [#allocation8], 4294966272  ;;  %1319 = vmatprep.subr.bf16.mxu0 %v1596_v0  ;;  %1265 = vmatprep.mubr.msk.f32.mxu0 %vm1597_vm0, %v1598_v1  ;;  %v1320_v5 = vpack.c.bf16 %v244_v3, %v243_v2  ;;  %v246_v6 = vld [vmem:[#allocation7 + $0x18] sm:$0xff]  ;;  %vm247_vm1 = vcmask 261120   ;;  %vm323_vm2 = vcmask 785664   ;;  %s1599_s21 = smov 64  }
  0x6b   : > { %1268 = vmatprep.subr.mxu1 %v1598_v1  ;;  %1270 = vmatprep.mubr.msk.f32.mxu1 %vm1597_vm0, %v1598_v1  ;;  %v1323_v7 = vpack.c.bf16 %v246_v6, %v245_v4  ;;  %v242_v8 = vld [vmem:[%s209_s8] sm:$0xff]  ;;  %s1600_s23 = smov 96   ;;  %s1601_s27 = smov 88   ;;  %vm329_vm3 = vcmask 64512   ;;  %vm663_vm4 = vcmask 130112   ;;  %vm836_vm5 = vcmask 195712  }
  0x6c   : > { %1321 = vmatpush3.bf16.msra.mxu0 %v1320_v5  ;;  %s1602_s30 = smov 120   ;;  %s1603_s5 = smov 80   ;;  %vm1009_vm6 = vcmask 261312  }
  0x6d   : > { %1322 = vmatprep.subr.bf16.mxu0 %v1596_v0  ;;  %s1604_s6 = smov 72   ;;  %s1605_s26 = smov 112  }
  0x6e   : > { %s1606_s10 = smov 104   ;;  %s1607_s24 = smov 56  }
  0x6f   : > { %s1608_s20 = smov 48   ;;  %s1609_s28 = smov 40  }
  0x70   : > { %1324 = vmatpush3.bf16.msra.mxu0 %v1323_v7  ;;  %s1610_s11 = smov 8   ;;  %s1611_s12 = smov 16  }
  0x71   : > { %1288 = vmatprep.subr.mxu0 %v1598_v1  ;;  %s1612_s7 = smov 24   ;;  %p1964_p0 = scmp.ne.s32.totalorder %s1959_s13, 0 }
  0x73   : > { %1266 = vmatmul.mubr.msk.f32.vlgmr.msra.gmra.mrb[0].mxu0 %vm247_vm1, %v242_v8  ;;  %v1012_v8 = vld [vmem:[#allocation9] sm:$0xff] }
  0x74   : > { %1290 = vmatprep.mubr.msk.f32.mxu0 %vm1597_vm0, %v1598_v1 }
 0x146   : > { %v317_v9 = vpop.f32.mrb[0].mxu0 }
 0x147   : > { %v321_v10 = vmul.f32 0.35355338, %v317_v9  ;;  %v1267_v11 = vpop.f32.mrb[1].mxu0 }
 0x148   : > { %v1014_v11 = vld [vmem:[#allocation9 + $0x10] sm:$0xff] }
 0x149   : > { %322 = vst.msk [vmem:[#allocation2] sm:$0xff] %vm247_vm1, %v321_v10 }
 0x14a   : > { %324 = vst.msk [vmem:[#allocation2] sm:$0xff] %vm323_vm2, %v317_v9  ;;  %v1013_v9 = vld [vmem:[#allocation9 + $0x8] sm:$0xff] }
 0x14b   : > { %v1326_v10 = vpack.c.bf16 %v1013_v9, %v1012_v8 }
 0x151   : > { %v1834_v12 = vld [vmem:[#allocation2] sm:$0xff] }
 0x152   : > { %415 = vrot.lane.b32.xlu1 %v1834_v12, %s1599_s21  ;;  %327 = vrot.lane.b32.xlu0 %v1834_v12, %s1600_s23  ;;  %s1228_s23 = sshll.u32 %s1660_s19, 7 }
 0x156   : > { %496 = vrot.lane.b32.xlu1 %v1834_v12, %s1601_s27  ;;  %s241_s27 = scalar_lea.vmem [#allocation10], %s1208_s25  ;;  %s1613_s25 = smov [#allocation10]  }
 0x15a   : > { %494 = vrot.lane.b32.xlu1 %v1834_v12, %s1602_s30  ;;  %s1111_s30 = sshll.u32 %s241_s27, 4  ;;  %s1903_s30 = int_to_ptr.vmem [resolvable:$true] %s1111_s30 }
 0x15b   : > { %s1519_s19 = scalar_lea.vmem %s1903_s30, 128 }
 0x15c   : > { %p1520_p11 = scmp.ne.s32.totalorder %s1903_s30, %s1519_s19 }
 0x15e   : > { %669 = vrot.lane.b32.xlu1 %v1834_v12, %s1603_s5  ;;  %p1521_p1 = pnand %p1520_p11, %p1964_p0 }
 0x160   : > { %p1522_p3 = pneg %p1521_p1 }
 0x1c4   : > { %v416_v13 = vpop.permute.xlu1 %415  ;;  %v328_v14 = vpop.permute.xlu0 %327 }
 0x1c5   : > { %1269 = vmatpush3.xpose.msk.msra.mxu1 %vm329_vm3, %v328_v14 }
 0x1c6   : > { %1273 = vmatprep.subr.mxu1 %v1598_v1 }
 0x1c8   : > { %v497_v15 = vpop.permute.xlu1 %496  ;;  %1271 = vmatmul.mubr.msk.f32.vlgmr.msra.gmra.mrb[0].mxu1 %vm329_vm3, %v1834_v12 }
 0x1c9   : > { %1274 = vmatpush3.msra.mxu1 %v416_v13  ;;  %1275 = vmatprep.mubr.msk.f32.mxu1 %vm1597_vm0, %v1598_v1 }
 0x1ca   : > { %1278 = vmatprep.subr.mxu1 %v1598_v1 }
 0x1cc   : > { %v495_v16 = vpop.permute.xlu1 %494 }
 0x1d0   : > { %v670_v17 = vpop.permute.xlu1 %669 }
 0x1d1   : > { %1289 = vmatpush3.xpose.msk.msra.mxu0 %vm329_vm3, %v670_v17 }
 0x1d2   : > { %1298 = vmatprep.subr.mxu0 %v1598_v1 }
 0x29b   : > { %v400_v18 = vpop.f32.mrb[0].mxu1 }
 0x29c   : > { %v1272_v19 = vpop.f32.mrb[1].mxu1  ;;  %v404_v20 = vsel %vm329_vm3, %v400_v18, -inf }
 0x29d   : > { %405 = vmax.xlane.f32.xlu0 %v404_v20 }
 0x2b3   : > { %842 = vrot.lane.b32.xlu0 %v1834_v12, %s1604_s6 }
 0x32a   : > { %v406_v21 = vpop.xlane.xlu0 %405 }
 0x32b   : > { %v407_v22 = vsub.f32 %v400_v18, %v406_v21 }
 0x32d   : > { %v408_v23 = vmul.f32 1.442695, %v407_v22  ;;  %v1225_v22 = vld [vmem:[%s1949_s3] ss:$0 sm:$0xff] }
 0x32e   : > { %v843_v28 = vpop.permute.xlu0 %842 }
 0x32f   : > { %1417 = vpow2.f32 %v408_v23 }
 0x339   : > { %v1418_v24 = vpop.eup %1417 }
 0x33a   : > { %v410_v25 = vsel %vm329_vm3, %v1418_v24, 0.0 }
 0x33b   : > { %411 = vadd.xlane.f32.xlu1 %v410_v25 }
 0x34c   : > { %667 = vrot.lane.b32.xlu1 %v1834_v12, %s1605_s26  ;;  %s1901_s26 = scalar_lea.hbm %s1950_s4, %s1228_s23 }
 0x350   : > { %840 = vrot.lane.b32.xlu1 %v1834_v12, %s1606_s10  ;;  %s1098_s10 = scalar_lea.sflag [#allocation6], %s1808_s29 }
 0x3c8   : > { %v412_v26 = vpop.xlane.xlu1 %411 }
 0x3c9   : > { %1419 = vrcp.f32 %v412_v26 }
 0x3cc   : > { %v668_v27 = vpop.permute.xlu1 %667 }
 0x3cd   : > { %1291 = vmatmul.mubr.msk.f32.vlgmr.msra.gmra.mrb[2].mxu0 %vm329_vm3, %v668_v27 }
 0x3ce   : > { %1299 = vmatpush3.xpose.msk.msra.mxu0 %vm329_vm3, %v843_v28  ;;  %1300 = vmatprep.mubr.msk.f32.mxu0 %vm1597_vm0, %v1598_v1 }
 0x3cf   : > { %1325 = vmatprep.subr.bf16.mxu0 %v1596_v0 }
 0x3d0   : > { %v841_v29 = vpop.permute.xlu1 %840 }
 0x3d1   : > { %1301 = vmatmul.mubr.msk.f32.vlgmr.msra.gmra.mrb[4].mxu0 %vm329_vm3, %v841_v29 }
 0x3d2   : > { %1316 = vmatprep.mubr.msk.f32.mxu0 %vm1597_vm0, %v1598_v1  ;;  %1327 = vmatpush3.bf16.msra.mxu0 %v1326_v10 }
 0x3d3   : > { %v1420_v30 = vpop.eup %1419  ;;  %1328 = vmatprep.subr.bf16.mxu0 %v1596_v0 }
 0x3d4   : > { %v414_v31 = vmul.f32 %v1420_v30, %v1418_v24 }
 0x3d6   : > { %1276 = vmatmul.mubr.msk.f32.vlgmr.msra.gmra.mrb[2].mxu1 %vm329_vm3, %v414_v31 }
 0x3d7   : > { %1279 = vmatpush3.xpose.msk.msra.mxu1 %vm329_vm3, %v497_v15  ;;  %1280 = vmatprep.mubr.msk.f32.mxu1 %vm1597_vm0, %v1598_v1 }
 0x3d8   : > { %1283 = vmatprep.subr.mxu1 %v1598_v1 }
 0x3da   : > { %1281 = vmatmul.mubr.msk.f32.vlgmr.msra.gmra.mrb[4].mxu1 %vm329_vm3, %v495_v16 }
 0x3db   : > { %1285 = vmatprep.mubr.msk.f32.mxu1 %vm1597_vm0, %v1598_v1 }
 0x4a0   : > { %v741_v32 = vpop.f32.mrb[2].mxu0 }
 0x4a1   : > { %v1292_v33 = vpop.f32.mrb[3].mxu0  ;;  %v745_v34 = vsel %vm329_vm3, %v741_v32, -inf }
 0x4a2   : > { %746 = vmax.xlane.f32.xlu0 %v745_v34 }
 0x4a4   : > { %v914_v35 = vpop.f32.mrb[4].mxu0 }
 0x4a5   : > { %v1302_v36 = vpop.f32.mrb[5].mxu0  ;;  %v918_v42 = vsel %vm329_vm3, %v914_v35, -inf }
 0x4a9   : > { %v487_v37 = vpop.f32.mrb[2].mxu1 }
 0x4aa   : > { %491 = vst.msk [vmem:[#allocation3] sm:$0xff] %vm329_vm3, %v487_v37  ;;  %v1277_v38 = vpop.f32.mrb[3].mxu1 }
 0x4ad   : > { %v568_v39 = vpop.f32.mrb[4].mxu1 }
 0x4ae   : > { %v1282_v40 = vpop.f32.mrb[5].mxu1  ;;  %v572_v41 = vsel %vm329_vm3, %v568_v39, -inf }
 0x4af   : > { %573 = vmax.xlane.f32.xlu1 %v572_v41 }
 0x4b3   : > { %919 = vmax.xlane.f32.xlu1 %v918_v42 }
 0x52f   : > { %v747_v43 = vpop.xlane.xlu0 %746 }
 0x530   : > { %v748_v44 = vsub.f32 %v741_v32, %v747_v43 }
 0x532   : > { %v749_v45 = vmul.f32 1.442695, %v748_v44 }
 0x534   : > { %1421 = vpow2.f32 %v749_v45 }
 0x53c   : > { %v574_v46 = vpop.xlane.xlu1 %573 }
 0x53d   : > { %v575_v54 = vsub.f32 %v568_v39, %v574_v46 }
 0x53e   : > { %v1422_v47 = vpop.eup %1421 }
 0x53f   : > { %v751_v48 = vsel %vm329_vm3, %v1422_v47, 0.0  ;;  %v576_v55 = vmul.f32 1.442695, %v575_v54 }
 0x540   : > { %752 = vadd.xlane.f32.xlu1 %v751_v48  ;;  %v920_v49 = vpop.xlane.xlu1 %919 }
 0x541   : > { %v921_v50 = vsub.f32 %v914_v35, %v920_v49 }
 0x543   : > { %v922_v51 = vmul.f32 1.442695, %v921_v50 }
 0x545   : > { %1423 = vpow2.f32 %v922_v51 }
 0x546   : > { %1425 = vpow2.f32 %v576_v55 }
 0x54f   : > { %v1424_v52 = vpop.eup %1423 }
 0x550   : > { %v924_v53 = vsel %vm329_vm3, %v1424_v52, 0.0  ;;  %v1426_v56 = vpop.eup %1425 }
 0x551   : > { %583 = vrot.lane.b32.xlu1 %v1834_v12, %s1607_s24  ;;  %925 = vadd.xlane.f32.xlu0 %v924_v53  ;;  %v578_v57 = vsel %vm329_vm3, %v1426_v56, 0.0  ;;  %s1523_s24 = sshll.u32 %s1613_s25, 4  ;;  %s1524_s24 = int_to_ptr.vmem [resolvable:$false] %s1523_s24 }
 0x552   : > { %p1526_p7 = scmp.lt.s32.totalorder %s1903_s30, %s1524_s24 }
 0x567   : > { %756 = vrot.lane.b32.xlu0 %v1834_v12, %s1608_s20  ;;  %s1525_s20 = scalar_lea.vmem %s1524_s24, 256 }
 0x568   : > { %p1527_p9 = scmp.lt.s32.totalorder %s1525_s20, %s1519_s19 }
 0x56a   : > { %p1528_p12 = por %p1527_p9, %p1526_p7 }
 0x56c   : > { %p1529_p2 = pnand %p1528_p12, %p1522_p3 }
 0x575   : > { %579 = vadd.xlane.f32.xlu1 %v578_v57 }
 0x586   : > { %929 = vrot.lane.b32.xlu1 %v1834_v12, %s1609_s28  ;;  %v1015_v12 = vld [vmem:[#allocation9 + $0x18] sm:$0xff] }
 0x587   : > { %v1329_v13 = vpack.c.bf16 %v1015_v12, %v1014_v11 }
 0x589   : > { %1330 = vmatpush3.bf16.msra.mxu0 %v1329_v13 }
 0x5cd   : > { %v753_v58 = vpop.xlane.xlu1 %752 }
 0x5d1   : > { %v584_v59 = vpop.permute.xlu1 %583 }
 0x5d2   : > { %1284 = vmatpush3.msra.mxu1 %v584_v59 }
 0x5d3   : > { %1293 = vmatprep.subr.mxu1 %v1598_v1 }
 0x5de   : > { %v926_v61 = vpop.xlane.xlu0 %925 }
 0x5e2   : > { %v757_v3 = vpop.permute.xlu0 %756 }
 0x602   : > { %v580_v60 = vpop.xlane.xlu1 %579 }
 0x603   : > { %1427 = vrcp.f32 %v580_v60 }
 0x604   : > { %1429 = vrcp.f32 %v753_v58 }
 0x605   : > { %1431 = vrcp.f32 %v926_v61 }
 0x606   : > { %v930_v6 = vpop.permute.xlu1 %929 }
 0x60d   : > { %v1428_v62 = vpop.eup %1427 }
 0x60e   : > { %v582_v63 = vmul.f32 %v1428_v62, %v1426_v56  ;;  %v1430_v2 = vpop.eup %1429 }
 0x60f   : > { %v755_v4 = vmul.f32 %v1430_v2, %v1422_v47  ;;  %v1432_v5 = vpop.eup %1431 }
 0x610   : > { %1286 = vmatmul.mubr.msk.f32.vlgmr.msra.gmra.mrb[6].mxu1 %vm329_vm3, %v582_v63  ;;  %v928_v7 = vmul.f32 %v1432_v5, %v1424_v52 }
 0x611   : > { %1294 = vmatpush3.msra.mxu1 %v757_v3  ;;  %1295 = vmatprep.mubr.msk.f32.mxu1 %vm1597_vm0, %v1598_v1 }
 0x612   : > { %1303 = vmatprep.subr.mxu1 %v1598_v1 }
 0x614   : > { %1296 = vmatmul.mubr.msk.f32.vlgmr.msra.gmra.mrb[8].mxu1 %vm329_vm3, %v755_v4 }
 0x615   : > { %1304 = vmatpush3.msra.mxu1 %v930_v6  ;;  %1305 = vmatprep.mubr.msk.f32.mxu1 %vm1597_vm0, %v1598_v1 }
 0x618   : > { %1306 = vmatmul.mubr.msk.f32.vlgmr.msra.gmra.mrb[10].mxu1 %vm329_vm3, %v928_v7 }
 0x6e3   : > { %v655_v14 = vpop.f32.mrb[6].mxu1 }
 0x6e4   : > { %660 = vrot.lane.b32.xlu1 %v655_v14, %s1610_s11  ;;  %v1287_v15 = vpop.f32.mrb[7].mxu1 }
 0x6e7   : > { %v828_v16 = vpop.f32.mrb[8].mxu1 }
 0x6e8   : > { %833 = vrot.lane.b32.xlu0 %v828_v16, %s1611_s12  ;;  %v1297_v1 = vpop.f32.mrb[9].mxu1 }
 0x6eb   : > { %v1001_v17 = vpop.f32.mrb[10].mxu1 }
 0x6ec   : > { %1006 = vrot.lane.b32.xlu1 %v1001_v17, %s1612_s7  ;;  %v1307_v18 = vpop.f32.mrb[11].mxu1 }
 0x756   : > { %v661_v19 = vpop.permute.xlu1 %660 }
 0x757   : > { %664 = vst.msk [vmem:[#allocation3] sm:$0xff] %vm663_vm4, %v661_v19 }
 0x75a   : > { %v834_v0 = vpop.permute.xlu0 %833 }
 0x75b   : > { %837 = vst.msk [vmem:[#allocation3] sm:$0xff] %vm836_vm5, %v834_v0 }
 0x75e   : > { %v1007_v20 = vpop.permute.xlu1 %1006 }
 0x75f   : > { %1010 = vst.msk [vmem:[#allocation3] sm:$0xff] %vm1009_vm6, %v1007_v20 }
 0x766   : > { %v1011_v21 = vld [vmem:[#allocation3] sm:$0xff] }
 0x767   : > { %1317 = vmatmul.mubr.msk.f32.vlgmr.msra.gmra.mrb[6].mxu0 %vm247_vm1, %v1011_v21 }
 0x83a   : > { %v1092_v23 = vpop.f32.mrb[6].mxu0 }
 0x83b   : > { %v1093_v24 = vadd.f32 %v1225_v22, %v1092_v23  ;;  %v1318_v25 = vpop.f32.mrb[7].mxu0 }
 0x83d   : > { %1096 = vst.msk [vmem:[%s241_s27] sm:$0xff] %vm247_vm1, %v1093_v24 }
 0x83e   : > { %1532 = shalt.err (!%p1529_p2)
}
 0x83f   : > { %s1533_s29 = scalar_lea.hbm %s1901_s26, 128  ;;  %s1537_s12 = scalar_lea.hbm %s1950_s4, 256 }
 0x840   : > { %p1534_p13 = scmp.ne.s32.totalorder %s1901_s26, %s1533_s29  ;;  %p1538_p4 = scmp.lt.u32.totalorder %s1901_s26, %s1950_s4 }
 0x841   : > { %p1539_p5 = scmp.lt.u32.totalorder %s1537_s12, %s1533_s29  ;;  %p1541_p11 = scmp.lt.u32.totalorder %s1533_s29, %s1901_s26 }
 0x842   : > { %p1535_p6 = pnand %p1534_p13, %p1964_p0 }
 0x843   : > { %p1540_p8 = por %p1539_p5, %p1538_p4 }
 0x844   : > { %p1536_p10 = pneg %p1535_p6 }
 0x845   : > { %p1542_p1 = por %p1541_p11, %p1540_p8 }
 0x847   : > { %p1543_p3 = pnand %p1542_p1, %p1536_p10 }
 0x849   : > { %1546 = shalt.err (!%p1543_p3)
}
 0x84a   : > { %1341 = dma.vmem_to_hbm [thread:$0]  (%p1964_p0), %s1903_s30, 128, %s1901_s26, %s1098_s10  }
 0x84b PF: > { %s1123_s21 = sand.u32 1, %s1577_s15   ;;  %p1965_p7 = scmp.ne.s32.totalorder %s1955_s22, 0 }
 0x84c   : > { %p1966_p9 = scmp.ge.s32.totalorder %s1589_s18, 2  ;;  %s1124_s23 = scalar_lea.sflag [#allocation6], %s1123_s21 }
 0x84e   : > { %p1355_p12 = pnand %p1966_p9, %p1965_p7 }
 0x850   : > { %1572 = dma.done.wait (!%p1355_p12), %s1124_s23, 128  }
 0x851   : > { %1574 = vsyncadd (!%p1355_p12), %s1124_s23, 4294967168  ;;  %p18_p2 = scmp.ge.s32.totalorder %s1749_s9, 4   ;;  %s1967_s15 = smov %s1581_s16 }
 0x852   : > { %s1968_s16 = smov %s1585_s17  ;;  %s1969_s17 = smov %s1765_s14 }
 0x853   : > { %s1970_s18 = smov %s1749_s9  ;;  %20 = sbr.rel (!%p18_p2) target bundleno = 6 (0x6), region = 89 }
 0x85a   :  { %1129 = vsyncpa [#allocation5], 1 }
 0x85b   :  { %1131 = vsyncpa [#allocation5 + $0x1], 1 }
 0x85c   :  { %1132 = vsyncpa [#allocation8], 1 }
 0x85d   :  { %1133 = vsyncpa [#allocation6], 1 }
 0x85e   :  { %1135 = vsyncpa [#allocation6 + $0x1], 1 }

</bundles_post_ra>
